<compile_context>
chip_gen: v6e
topology: v6e:2x2x1
jax: 0.10.0
libtpu: 0.0.40
codegen_flags: <defaults>
</compile_context>

<pallas_src>
import jax
import jax.numpy as jnp
from jax.experimental import pallas as pl
from jax.experimental.pallas import tpu as pltpu


# --------------------------------------------------------------------------- #
# Kernel body: one VPU add per loaded vreg (purely HBM-bandwidth bound).
# --------------------------------------------------------------------------- #
def _double_kernel(x_ref, o_ref):
    o_ref[...] = x_ref[...] + x_ref[...]


# Tunables (conservative across v5e / v6e / v7x).
_TARGET_TILE_BYTES = 4 * 1024 * 1024     # ~4 MiB per tile of *padded* VMEM
_VMEM_BUDGET_BYTES = 24 * 1024 * 1024    # 4x tile (double-buffered in + out)
_VMEM_LIMIT_BYTES = 32 * 1024 * 1024     # scoped-VMEM limit handed to Mosaic
_MIN_TILES = 4                           # keep pipeline busy; lets v7x's 2 TCs split
_SMALL_BYPASS_BYTES = 1 << 20            # < 1 MiB: let XLA fuse the add
_LANE_WIDTHS = (1024, 512, 256, 128)     # preferred lane-dense last dims


def _round_up(v, m):
    return -(-v // m) * m


def _lane_dense_view(x):
    """Flatten to (M, L) with a wide lane axis.

    Returns (x2d, orig_total) where orig_total is None unless the array had to
    be padded (caller then slices the flat output back to orig_total).
    """
    total = x.size
    # Preferred: L an exact multiple of 128 -> unmasked full-width stores.
    for w in _LANE_WIDTHS:
        if total % w == 0:
            return x.reshape(total // w, w), None
    # Fallback: largest divisor of total in [128, 2048]; lane axis is at least
    # one vreg wide, so lane padding waste is < 2x.
    for w in range(2048, 127, -1):
        if total % w == 0:
            return x.reshape(total // w, w), None
    # Last resort: pad the flat array to a multiple of 512 (costs one extra
    # HBM pass but keeps every store lane-dense); caller slices back.
    pad = (-total) % 512
    flat = jnp.pad(x.reshape(-1), (0, pad))
    return flat.reshape(-1, 512), total


def _double_pallas(x2d):
    M, N = x2d.shape
    itemsize = jnp.dtype(x2d.dtype).itemsize
    padded_n = _round_up(N, 128)                       # VMEM pads lanes to 128

    # Column tile: full width unless even an 8-row slab of padded rows would
    # blow the double-buffered VMEM budget (rare: extremely wide rows).
    tn = N
    if 4 * 8 * padded_n * itemsize > _VMEM_BUDGET_BYTES:
        tn = max(128, (_VMEM_BUDGET_BYTES // (4 * 8 * itemsize)) // 128 * 128)
    padded_tn = _round_up(tn, 128)
    row_bytes = padded_tn * itemsize                   # padded VMEM bytes / row

    # Row tile: ~_TARGET_TILE_BYTES of *padded* VMEM, rows a multiple of 8,
    # and never a single block — keep >= _MIN_TILES tiles when M allows so the
    # pipeline overlaps and v7x can shard the "parallel" axis across both TCs.
    if M <= 8:
        tm = M                                          # full-dim block is legal
    else:
        tm = max(8, (_TARGET_TILE_BYTES // row_bytes) // 8 * 8)
        tm_cap = max(8, _round_up(pl.cdiv(M, _MIN_TILES), 8))
        tm = min(tm, tm_cap)

    # 2 buffers x (in + out) x tile must fit the scoped-VMEM limit.
    tile_bytes = tm * row_bytes
    assert 4 * tile_bytes <= _VMEM_LIMIT_BYTES, (
        f"double-buffered footprint {4 * tile_bytes} exceeds VMEM limit")

    grid = (pl.cdiv(M, tm), pl.cdiv(N, tn))
    # TODO(synk): add input_output_aliases={0: 0} when x is donated at a jit
    # boundary to reuse the input HBM buffer for the output.
    return pl.pallas_call(
        _double_kernel,
        out_shape=jax.ShapeDtypeStruct((M, N), x2d.dtype),
        grid=grid,
        in_specs=[pl.BlockSpec((tm, tn), lambda i, j: (i, j))],
        out_specs=pl.BlockSpec((tm, tn), lambda i, j: (i, j)),
        compiler_params=pltpu.CompilerParams(
            dimension_semantics=("parallel", "parallel"),
            vmem_limit_bytes=_VMEM_LIMIT_BYTES,
        ),
    )(x2d)


def fp32_model_forward(x):
    """Pallas equivalent of FP32Model.forward.

    If x.shape[1] == 1 -> x + x, else -> x. The channel check is a static
    shape property (mirrors torch's x.size(1)), so the branch costs nothing.
    """
    times = x.shape[1]
    if times != 1:
        return x                                # identity: no kernel launch

    itemsize = jnp.dtype(x.dtype).itemsize
    if x.size * itemsize < _SMALL_BYPASS_BYTES:
        return x + x                            # tiny: launch overhead dominates

    orig_shape = x.shape
    x2d, orig_total = _lane_dense_view(x)
    out2d = _double_pallas(x2d)
    if orig_total is not None:                  # padded fallback: slice back
        return out2d.reshape(-1)[:orig_total].reshape(orig_shape)
    return out2d.reshape(orig_shape)


if __name__ == "__main__":
    key = jax.random.PRNGKey(0)
    k1, k2, k3, k4 = jax.random.split(key, 4)

    # Path 1: times != 1 -> identity (no kernel launch).
    x_multi = jax.random.normal(k1, (2, 4, 16, 16), dtype=jnp.float32)
    out_multi = jax.block_until_ready(fp32_model_forward(x_multi))
    assert out_multi.shape == x_multi.shape
    assert jnp.allclose(out_multi, x_multi), "identity path mismatch"

    # Path 2: times == 1, tiny input -> XLA bypass (still x + x).
    x_small = jax.random.normal(k2, (2, 1, 16, 16), dtype=jnp.float32)
    out_small = jax.block_until_ready(fp32_model_forward(x_small))
    assert out_small.shape == x_small.shape
    assert jnp.allclose(out_small, x_small + x_small), "small x + x mismatch"

    # Path 3: times == 1, >= 1 MiB -> Pallas kernel, lane-dense 1024-wide view,
    # 4 row tiles (pipelined, even tile count for v7x).
    x_big = jax.random.normal(k3, (2, 1, 256, 512), dtype=jnp.float32)
    out_big = jax.block_until_ready(fp32_model_forward(x_big))
    assert out_big.shape == x_big.shape
    assert jnp.allclose(out_big, x_big + x_big), "x + x (large) path mismatch"

    # Path 4: element count not a multiple of 128 -> divisor fallback view.
    x_odd = jax.random.normal(k4, (1, 1, 257, 1023), dtype=jnp.float32)
    out_odd = jax.block_until_ready(fp32_model_forward(x_odd))
    assert out_odd.shape == x_odd.shape
    assert jnp.allclose(out_odd, x_odd + x_odd), "x + x (odd-shape) path mismatch"

    print("KERNEL_OK")
</pallas_src>

<mosaic_0001>
module attributes {stable_mosaic.version = 11 : i64} {
  func.func @_double_kernel(%arg0: i32, %arg1: i32, %arg2: memref<64x1024xf32, #tpu.memory_space<vmem>>, %arg3: memref<64x1024xf32, #tpu.memory_space<vmem>>) attributes {dimension_semantics = [#tpu.dimension_semantics<parallel>, #tpu.dimension_semantics<parallel>], iteration_bounds = array<i64: 4, 1>, scalar_prefetch = 0 : i64, scratch_operands = 0 : i64, tpu.core_type = #tpu.core_type<tc>, window_params = [{transform_indices = @transform_0, window_bounds = array<i64: 64, 1024>}, {transform_indices = @transform_1, window_bounds = array<i64: 64, 1024>}]} {
    %c0 = arith.constant 0 : index
    %c0_0 = arith.constant 0 : index
    %0 = vector.load %arg2[%c0, %c0_0] : memref<64x1024xf32, #tpu.memory_space<vmem>>, vector<64x1024xf32>
    %c0_1 = arith.constant 0 : index
    %c0_2 = arith.constant 0 : index
    %1 = vector.load %arg2[%c0_1, %c0_2] : memref<64x1024xf32, #tpu.memory_space<vmem>>, vector<64x1024xf32>
    %2 = arith.addf %0, %1 : vector<64x1024xf32>
    %c0_3 = arith.constant 0 : index
    %c0_4 = arith.constant 0 : index
    %3 = vector.load %arg3[%c0_3, %c0_4] : memref<64x1024xf32, #tpu.memory_space<vmem>>, vector<64x1024xf32>
    tpu.vector_store %arg3[%c0_3, %c0_4], %2 {strides = array<i32>} : memref<64x1024xf32, #tpu.memory_space<vmem>>, vector<64x1024xf32>,
    return
  }
  func.func @transform_0(%arg0: i32, %arg1: i32) -> (i32, i32) {
    %c0_i32 = arith.constant 0 : i32
    return %arg0, %arg1 : i32, i32
  }
  func.func @transform_1(%arg0: i32, %arg1: i32) -> (i32, i32) {
    %c0_i32 = arith.constant 0 : i32
    return %arg0, %arg1 : i32, i32
  }
}

</mosaic_0001>

<bundles_post_ra>
// kernel: tpu_custom_call.1
= control target key start
LH: loop header
LB: loop body
LE: loop exit
PB: predicated region body
PF: predicated region fallthrough
CT: control target
= control target key end

     0   :  { %6 = vsyncpa [#allocation3], 0  ;;  %s944_s0 = inlined_call_operand.hbm [shape: f32[256,1024], index: 0, kind: input, shape index: {}]   ;;  %s945_s1 = inlined_call_operand.hbm [shape: f32[256,1024], index: 1, kind: output, shape index: {}]  }
   0x1   :  { %8 = vsyncpa [#allocation3 + $0x1], 0 }
   0x2   :  { %9 = vsyncpa [#allocation4], 0 }
   0x3   :  { %11 = vsyncpa [#allocation4 + $0x1], 0  ;;  %s667_s6 = smov 0   ;;  %s669_s7 = smov 0  }
   0x4   :  { %s671_s8 = smov 0   ;;  %s673_s9 = smov 0  }
   0x5   :  { %s675_s10 = smov 0   ;;  %s677_s11 = smov 0  }
   0x6 LB: > { %s454_s12 = sadd.s32 4294967295, %s649_s11   ;;  %s455_s13 = sadd.s32 4294967294, %s649_s11   ;;  %s649_s11 = sphi %s677_s11, %s17_s11   ;;  %s645_s10 = sphi %s675_s10, %s955_s10   ;;  %s641_s9 = sphi %s673_s9, %s954_s9   ;;  %s637_s8 = sphi %s671_s8, %s953_s8   ;;  %s633_s7 = sphi %s669_s7, %s952_s7   ;;  %s629_s6 = sphi %s667_s6, %s951_s6  }
   0x7   : > { %s29_s14 = sadd.s32 1, %s645_s10  ;;  %s38_s15 = sadd.s32 1, %s637_s8 }
   0x8   : > { %p31_p0 = scmp.ge.s32.totalorder %s29_s14, 4  ;;  %p45_p1 = scmp.ne.s32.totalorder %s637_s8, %s633_s7 }
   0x9   : > { %p46_p2 = scmp.eq.s32.totalorder %s649_s11, 0  ;;  %p51_p3 = scmp.ne.s32.totalorder %s633_s7, %s629_s6 }
   0xa   : > { %s957_s14 = smov (%p31_p0, %s29_s14), 0  ;;  %p52_p5 = scmp.eq.s32.totalorder %s454_s12, 0 }
   0xb   : > { %p708_p4 = por %p46_p2, %p45_p1  ;;  %s33_s17 = ssub.s32 %s645_s10, %s957_s14 }
   0xc   : > { %p77_p6 = scmp.eq.s32.totalorder %s454_s12, 3  ;;  %p36_p7 = scmp.eq.s32.totalorder %s33_s17, 0 }
   0xd   : > { %p714_p8 = por %p52_p5, %p51_p3  ;;  %p83_p10 = scmp.eq.s32.totalorder %s455_s13, 3 }
   0xe   : > { %p718_p9 = por %p77_p6, %p45_p1  ;;  %p487_p12 = scmp.lt.s32.totalorder %s649_s11, 4 }
   0xf   : > { %s723_s20 = scalar_select %p36_p7, %s637_s8, %s38_s15  }
  0x10   : > { %p725_p11 = por %p83_p10, %p51_p3  ;;  %s103_s22 = sand.u32 1, %s637_s8  }
  0x11   : > { %s458_s23 = sshll.u32 %s103_s22, 9  ;;  %s472_s24 = sshll.u32 %s645_s10, 13 }
  0x12   : > { %s116_s27 = scalar_lea.hbm %s944_s0, %s472_s24  ;;  %s107_s28 = scalar_lea.vmem [#allocation2], %s458_s23 }
  0x13   : > { %s117_s29 = sshll.u32 %s107_s28, 4  ;;  %p737_p13 = pnand %p487_p12, %p708_p4  ;;  %s118_s29 = int_to_ptr.vmem [resolvable:$true] %s117_s29 }
  0x14   : > { %p462_p0 = scmp.ge.s32.totalorder %s649_s11, 1  ;;  %s104_s2 = scalar_lea.sflag [#allocation3], %s103_s22 }
  0x15   : > { %p543_p1 = pneg %p737_p13  ;;  %s554_s3 = scalar_lea.vmem %s118_s29, 8192 }
  0x16   : > { %p555_p2 = scmp.ne.s32.totalorder %s118_s29, %s554_s3  ;;  %s651_s4 = smov [#allocation2]  }
  0x17   : > { %s559_s5 = sshll.u32 %s651_s4, 4  ;;  %s560_s5 = int_to_ptr.vmem [resolvable:$false] %s559_s5 }
  0x18   : > { %p557_p3 = pnand %p555_p2, %p543_p1  ;;  %s561_s12 = scalar_lea.vmem %s560_s5, 16384 }
  0x19   : > { %p562_p6 = scmp.lt.s32.totalorder %s118_s29, %s560_s5  ;;  %p563_p7 = scmp.lt.s32.totalorder %s561_s12, %s554_s3 }
  0x1a   : > { %p558_p5 = pneg %p557_p3 }
  0x1b   : > { %p564_p10 = por %p563_p7, %p562_p6 }
  0x1d   : > { %p565_p4 = pnand %p564_p10, %p558_p5 }
  0x1f   : > { %568 = shalt.err (!%p565_p4)
}
  0x20   : > { %s652_s13 = smov 1024   ;;  %s653_s15 = smov 64  }
  0x21   : > { %482 = dma.hbm_to_vmem [thread:$0]  (!%p737_p13), %s116_s27, 8192, %s118_s29, %s104_s2, %s652_s13, %s652_s13, %s653_s15  }
  0x22   : > { %p125_p12 = scmp.lt.s32.totalorder %s649_s11, 5 }
  0x24   : > { %p126_p1 = pnand %p462_p0, %p125_p12 }
  0x25   : > { %s750_s16 = sand.u32 (!%p126_p1), 1, %s633_s7  }
  0x26   : > { %129 = sbr.rel (%p126_p1) target bundleno = 92 (0x5c), region = 24  ;;  %s463_s17 = sshll.u32 (!%p126_p1), %s750_s16, 9 }
  0x27   : > { %s132_s22 = scalar_lea.sflag (!%p126_p1), [#allocation3], %s750_s16  ;;  %s754_s23 = scalar_lea.vmem (!%p126_p1), [#allocation2], %s463_s17 }
  0x2b   : > { %620 = dma.done.wait (%p714_p8), %s132_s22, 8192  }
  0x2c   : > { %622 = vsyncadd (%p714_p8), %s132_s22, 4294959104  ;;  %v158_v0 = vld [vmem:[%s754_s23] sm:$0xff]  ;;  %v159_v1 = vld [vmem:[%s754_s23 + $0x8] sm:$0xff]  ;;  %s769_s18 = scalar_lea.vmem [#allocation5], %s463_s17  ;;  %s474_s24 = sshll.u32 %s641_s9, 13 }
  0x2d   : > { %v160_v2 = vld [vmem:[%s754_s23 + $0x10] sm:$0xff]  ;;  %v222_v3 = vadd.f32 %v158_v0, %v158_v0  ;;  %v223_v4 = vadd.f32 %v159_v1, %v159_v1  ;;  %v161_v6 = vld [vmem:[%s754_s23 + $0x18] sm:$0xff]  ;;  %v162_v7 = vld [vmem:[%s754_s23 + $0x20] sm:$0xff]  ;;  %s367_s25 = sshll.u32 %s769_s18, 4  ;;  %s888_s27 = scalar_lea.hbm %s945_s1, %s474_s24  ;;  %s890_s25 = int_to_ptr.vmem [resolvable:$true] %s367_s25 }
  0x2e   : > { %v224_v5 = vadd.f32 %v160_v2, %v160_v2  ;;  %v163_v8 = vld [vmem:[%s754_s23 + $0x28] sm:$0xff]  ;;  %v225_v9 = vadd.f32 %v161_v6, %v161_v6  ;;  %v226_v10 = vadd.f32 %v162_v7, %v162_v7  ;;  %v164_v12 = vld [vmem:[%s754_s23 + $0x30] sm:$0xff]  ;;  %v165_v13 = vld [vmem:[%s754_s23 + $0x38] sm:$0xff]  ;;  %s351_s28 = scalar_lea.sflag [#allocation4], %s750_s16  ;;  %s569_s29 = scalar_lea.vmem %s890_s25, 8192 }
  0x2f   : > { %v227_v11 = vadd.f32 %v163_v8, %v163_v8  ;;  %v166_v14 = vld [vmem:[%s754_s23 + $0x40] sm:$0xff]  ;;  %286 = vst [vmem:[%s769_s18] sm:$0xff] %v222_v3  ;;  %287 = vst [vmem:[%s769_s18 + $0x8] sm:$0xff] %v223_v4  ;;  %v228_v15 = vadd.f32 %v164_v12, %v164_v12  ;;  %v229_v16 = vadd.f32 %v165_v13, %v165_v13  ;;  %v167_v18 = vld [vmem:[%s754_s23 + $0x48] sm:$0xff]  ;;  %p570_p8 = scmp.ne.s32.totalorder %s890_s25, %s569_s29  ;;  %s654_s30 = smov [#allocation5]  }
  0x30   : > { %288 = vst [vmem:[%s769_s18 + $0x10] sm:$0xff] %v224_v5  ;;  %v230_v17 = vadd.f32 %v166_v14, %v166_v14  ;;  %v168_v19 = vld [vmem:[%s754_s23 + $0x50] sm:$0xff]  ;;  %v169_v20 = vld [vmem:[%s754_s23 + $0x58] sm:$0xff]  ;;  %289 = vst [vmem:[%s769_s18 + $0x18] sm:$0xff] %v225_v9  ;;  %v231_v21 = vadd.f32 %v167_v18, %v167_v18  ;;  %s573_s2 = sshll.u32 %s654_s30, 4  ;;  %s574_s2 = int_to_ptr.vmem [resolvable:$false] %s573_s2 }
  0x31   : > { %290 = vst [vmem:[%s769_s18 + $0x20] sm:$0xff] %v226_v10  ;;  %291 = vst [vmem:[%s769_s18 + $0x28] sm:$0xff] %v227_v11  ;;  %v232_v22 = vadd.f32 %v168_v19, %v168_v19  ;;  %v233_v23 = vadd.f32 %v169_v20, %v169_v20  ;;  %v170_v24 = vld [vmem:[%s754_s23 + $0x60] sm:$0xff]  ;;  %v171_v25 = vld [vmem:[%s754_s23 + $0x68] sm:$0xff]  ;;  %p571_p13 = pnand %p570_p8, %p718_p9  ;;  %s575_s3 = scalar_lea.vmem %s574_s2, 16384 }
  0x32   : > { %v172_v26 = vld [vmem:[%s754_s23 + $0x70] sm:$0xff]  ;;  %292 = vst [vmem:[%s769_s18 + $0x30] sm:$0xff] %v228_v15  ;;  %293 = vst [vmem:[%s769_s18 + $0x38] sm:$0xff] %v229_v16  ;;  %v234_v27 = vadd.f32 %v170_v24, %v170_v24  ;;  %v235_v28 = vadd.f32 %v171_v25, %v171_v25  ;;  %v173_v30 = vld [vmem:[%s754_s23 + $0x78] sm:$0xff]  ;;  %p576_p2 = scmp.lt.s32.totalorder %s890_s25, %s574_s2  ;;  %p577_p3 = scmp.lt.s32.totalorder %s575_s3, %s569_s29 }
  0x33   : > { %294 = vst [vmem:[%s769_s18 + $0x40] sm:$0xff] %v230_v17  ;;  %v236_v29 = vadd.f32 %v172_v26, %v172_v26  ;;  %v174_v31 = vld [vmem:[%s754_s23 + $0x80] sm:$0xff]  ;;  %v175_v32 = vld [vmem:[%s754_s23 + $0x88] sm:$0xff]  ;;  %295 = vst [vmem:[%s769_s18 + $0x48] sm:$0xff] %v231_v21  ;;  %v237_v33 = vadd.f32 %v173_v30, %v173_v30  ;;  %p572_p0 = pneg %p571_p13 }
  0x34   : > { %296 = vst [vmem:[%s769_s18 + $0x50] sm:$0xff] %v232_v22  ;;  %297 = vst [vmem:[%s769_s18 + $0x58] sm:$0xff] %v233_v23  ;;  %v238_v34 = vadd.f32 %v174_v31, %v174_v31  ;;  %v239_v35 = vadd.f32 %v175_v32, %v175_v32  ;;  %v176_v36 = vld [vmem:[%s754_s23 + $0x90] sm:$0xff]  ;;  %v177_v37 = vld [vmem:[%s754_s23 + $0x98] sm:$0xff]  ;;  %p578_p5 = por %p577_p3, %p576_p2 }
  0x35   : > { %v178_v38 = vld [vmem:[%s754_s23 + $0xa0] sm:$0xff]  ;;  %298 = vst [vmem:[%s769_s18 + $0x60] sm:$0xff] %v234_v27  ;;  %299 = vst [vmem:[%s769_s18 + $0x68] sm:$0xff] %v235_v28  ;;  %v240_v39 = vadd.f32 %v176_v36, %v176_v36  ;;  %v241_v40 = vadd.f32 %v177_v37, %v177_v37  ;;  %v179_v42 = vld [vmem:[%s754_s23 + $0xa8] sm:$0xff] }
  0x36   : > { %300 = vst [vmem:[%s769_s18 + $0x70] sm:$0xff] %v236_v29  ;;  %v242_v41 = vadd.f32 %v178_v38, %v178_v38  ;;  %v180_v43 = vld [vmem:[%s754_s23 + $0xb0] sm:$0xff]  ;;  %v181_v44 = vld [vmem:[%s754_s23 + $0xb8] sm:$0xff]  ;;  %301 = vst [vmem:[%s769_s18 + $0x78] sm:$0xff] %v237_v33  ;;  %v243_v45 = vadd.f32 %v179_v42, %v179_v42  ;;  %p579_p6 = pnand %p578_p5, %p572_p0 }
  0x37   : > { %302 = vst [vmem:[%s769_s18 + $0x80] sm:$0xff] %v238_v34  ;;  %303 = vst [vmem:[%s769_s18 + $0x88] sm:$0xff] %v239_v35  ;;  %v244_v46 = vadd.f32 %v180_v43, %v180_v43  ;;  %v245_v47 = vadd.f32 %v181_v44, %v181_v44  ;;  %v182_v48 = vld [vmem:[%s754_s23 + $0xc0] sm:$0xff]  ;;  %v183_v49 = vld [vmem:[%s754_s23 + $0xc8] sm:$0xff] }
  0x38   : > { %v184_v50 = vld [vmem:[%s754_s23 + $0xd0] sm:$0xff]  ;;  %304 = vst [vmem:[%s769_s18 + $0x90] sm:$0xff] %v240_v39  ;;  %305 = vst [vmem:[%s769_s18 + $0x98] sm:$0xff] %v241_v40  ;;  %v246_v51 = vadd.f32 %v182_v48, %v182_v48  ;;  %v247_v52 = vadd.f32 %v183_v49, %v183_v49  ;;  %v185_v54 = vld [vmem:[%s754_s23 + $0xd8] sm:$0xff] }
  0x39   : > { %306 = vst [vmem:[%s769_s18 + $0xa0] sm:$0xff] %v242_v41  ;;  %v248_v53 = vadd.f32 %v184_v50, %v184_v50  ;;  %v186_v55 = vld [vmem:[%s754_s23 + $0xe0] sm:$0xff]  ;;  %v187_v56 = vld [vmem:[%s754_s23 + $0xe8] sm:$0xff]  ;;  %307 = vst [vmem:[%s769_s18 + $0xa8] sm:$0xff] %v243_v45  ;;  %v249_v57 = vadd.f32 %v185_v54, %v185_v54 }
  0x3a   : > { %308 = vst [vmem:[%s769_s18 + $0xb0] sm:$0xff] %v244_v46  ;;  %309 = vst [vmem:[%s769_s18 + $0xb8] sm:$0xff] %v245_v47  ;;  %v250_v58 = vadd.f32 %v186_v55, %v186_v55  ;;  %v251_v59 = vadd.f32 %v187_v56, %v187_v56  ;;  %v188_v60 = vld [vmem:[%s754_s23 + $0xf0] sm:$0xff]  ;;  %v189_v61 = vld [vmem:[%s754_s23 + $0xf8] sm:$0xff] }
  0x3b   : > { %v190_v62 = vld [vmem:[%s754_s23 + $0x100] sm:$0xff]  ;;  %310 = vst [vmem:[%s769_s18 + $0xc0] sm:$0xff] %v246_v51  ;;  %311 = vst [vmem:[%s769_s18 + $0xc8] sm:$0xff] %v247_v52  ;;  %v252_v63 = vadd.f32 %v188_v60, %v188_v60  ;;  %v253_v0 = vadd.f32 %v189_v61, %v189_v61  ;;  %v191_v2 = vld [vmem:[%s754_s23 + $0x108] sm:$0xff] }
  0x3c   : > { %312 = vst [vmem:[%s769_s18 + $0xd0] sm:$0xff] %v248_v53  ;;  %v254_v1 = vadd.f32 %v190_v62, %v190_v62  ;;  %v192_v3 = vld [vmem:[%s754_s23 + $0x110] sm:$0xff]  ;;  %v193_v4 = vld [vmem:[%s754_s23 + $0x118] sm:$0xff]  ;;  %313 = vst [vmem:[%s769_s18 + $0xd8] sm:$0xff] %v249_v57  ;;  %v255_v5 = vadd.f32 %v191_v2, %v191_v2 }
  0x3d   : > { %314 = vst [vmem:[%s769_s18 + $0xe0] sm:$0xff] %v250_v58  ;;  %315 = vst [vmem:[%s769_s18 + $0xe8] sm:$0xff] %v251_v59  ;;  %v256_v6 = vadd.f32 %v192_v3, %v192_v3  ;;  %v257_v7 = vadd.f32 %v193_v4, %v193_v4  ;;  %v194_v8 = vld [vmem:[%s754_s23 + $0x120] sm:$0xff]  ;;  %v195_v9 = vld [vmem:[%s754_s23 + $0x128] sm:$0xff] }
  0x3e   : > { %v196_v10 = vld [vmem:[%s754_s23 + $0x130] sm:$0xff]  ;;  %316 = vst [vmem:[%s769_s18 + $0xf0] sm:$0xff] %v252_v63  ;;  %317 = vst [vmem:[%s769_s18 + $0xf8] sm:$0xff] %v253_v0  ;;  %v258_v11 = vadd.f32 %v194_v8, %v194_v8  ;;  %v259_v12 = vadd.f32 %v195_v9, %v195_v9  ;;  %v197_v14 = vld [vmem:[%s754_s23 + $0x138] sm:$0xff] }
  0x3f   : > { %318 = vst [vmem:[%s769_s18 + $0x100] sm:$0xff] %v254_v1  ;;  %v260_v13 = vadd.f32 %v196_v10, %v196_v10  ;;  %v198_v15 = vld [vmem:[%s754_s23 + $0x140] sm:$0xff]  ;;  %v199_v16 = vld [vmem:[%s754_s23 + $0x148] sm:$0xff]  ;;  %319 = vst [vmem:[%s769_s18 + $0x108] sm:$0xff] %v255_v5  ;;  %v261_v17 = vadd.f32 %v197_v14, %v197_v14 }
  0x40   : > { %320 = vst [vmem:[%s769_s18 + $0x110] sm:$0xff] %v256_v6  ;;  %321 = vst [vmem:[%s769_s18 + $0x118] sm:$0xff] %v257_v7  ;;  %v262_v18 = vadd.f32 %v198_v15, %v198_v15  ;;  %v263_v19 = vadd.f32 %v199_v16, %v199_v16  ;;  %v200_v20 = vld [vmem:[%s754_s23 + $0x150] sm:$0xff]  ;;  %v201_v21 = vld [vmem:[%s754_s23 + $0x158] sm:$0xff] }
  0x41   : > { %v202_v22 = vld [vmem:[%s754_s23 + $0x160] sm:$0xff]  ;;  %322 = vst [vmem:[%s769_s18 + $0x120] sm:$0xff] %v258_v11  ;;  %323 = vst [vmem:[%s769_s18 + $0x128] sm:$0xff] %v259_v12  ;;  %v264_v23 = vadd.f32 %v200_v20, %v200_v20  ;;  %v265_v24 = vadd.f32 %v201_v21, %v201_v21  ;;  %v203_v26 = vld [vmem:[%s754_s23 + $0x168] sm:$0xff] }
  0x42   : > { %324 = vst [vmem:[%s769_s18 + $0x130] sm:$0xff] %v260_v13  ;;  %v266_v25 = vadd.f32 %v202_v22, %v202_v22  ;;  %v204_v27 = vld [vmem:[%s754_s23 + $0x170] sm:$0xff]  ;;  %v205_v28 = vld [vmem:[%s754_s23 + $0x178] sm:$0xff]  ;;  %325 = vst [vmem:[%s769_s18 + $0x138] sm:$0xff] %v261_v17  ;;  %v267_v29 = vadd.f32 %v203_v26, %v203_v26 }
  0x43   : > { %326 = vst [vmem:[%s769_s18 + $0x140] sm:$0xff] %v262_v18  ;;  %327 = vst [vmem:[%s769_s18 + $0x148] sm:$0xff] %v263_v19  ;;  %v268_v30 = vadd.f32 %v204_v27, %v204_v27  ;;  %v269_v31 = vadd.f32 %v205_v28, %v205_v28  ;;  %v206_v32 = vld [vmem:[%s754_s23 + $0x180] sm:$0xff]  ;;  %v207_v33 = vld [vmem:[%s754_s23 + $0x188] sm:$0xff] }
  0x44   : > { %v208_v34 = vld [vmem:[%s754_s23 + $0x190] sm:$0xff]  ;;  %328 = vst [vmem:[%s769_s18 + $0x150] sm:$0xff] %v264_v23  ;;  %329 = vst [vmem:[%s769_s18 + $0x158] sm:$0xff] %v265_v24  ;;  %v270_v35 = vadd.f32 %v206_v32, %v206_v32  ;;  %v271_v36 = vadd.f32 %v207_v33, %v207_v33  ;;  %v209_v38 = vld [vmem:[%s754_s23 + $0x198] sm:$0xff] }
  0x45   : > { %330 = vst [vmem:[%s769_s18 + $0x160] sm:$0xff] %v266_v25  ;;  %v272_v37 = vadd.f32 %v208_v34, %v208_v34  ;;  %v210_v39 = vld [vmem:[%s754_s23 + $0x1a0] sm:$0xff]  ;;  %v211_v40 = vld [vmem:[%s754_s23 + $0x1a8] sm:$0xff]  ;;  %331 = vst [vmem:[%s769_s18 + $0x168] sm:$0xff] %v267_v29  ;;  %v273_v41 = vadd.f32 %v209_v38, %v209_v38 }
  0x46   : > { %332 = vst [vmem:[%s769_s18 + $0x170] sm:$0xff] %v268_v30  ;;  %333 = vst [vmem:[%s769_s18 + $0x178] sm:$0xff] %v269_v31  ;;  %v274_v42 = vadd.f32 %v210_v39, %v210_v39  ;;  %v275_v43 = vadd.f32 %v211_v40, %v211_v40  ;;  %v212_v44 = vld [vmem:[%s754_s23 + $0x1b0] sm:$0xff]  ;;  %v213_v45 = vld [vmem:[%s754_s23 + $0x1b8] sm:$0xff] }
  0x47   : > { %v214_v46 = vld [vmem:[%s754_s23 + $0x1c0] sm:$0xff]  ;;  %334 = vst [vmem:[%s769_s18 + $0x180] sm:$0xff] %v270_v35  ;;  %335 = vst [vmem:[%s769_s18 + $0x188] sm:$0xff] %v271_v36  ;;  %v276_v47 = vadd.f32 %v212_v44, %v212_v44  ;;  %v277_v48 = vadd.f32 %v213_v45, %v213_v45  ;;  %v215_v50 = vld [vmem:[%s754_s23 + $0x1c8] sm:$0xff] }
  0x48   : > { %336 = vst [vmem:[%s769_s18 + $0x190] sm:$0xff] %v272_v37  ;;  %v278_v49 = vadd.f32 %v214_v46, %v214_v46  ;;  %v216_v51 = vld [vmem:[%s754_s23 + $0x1d0] sm:$0xff]  ;;  %v217_v52 = vld [vmem:[%s754_s23 + $0x1d8] sm:$0xff]  ;;  %337 = vst [vmem:[%s769_s18 + $0x198] sm:$0xff] %v273_v41  ;;  %v279_v53 = vadd.f32 %v215_v50, %v215_v50 }
  0x49   : > { %338 = vst [vmem:[%s769_s18 + $0x1a0] sm:$0xff] %v274_v42  ;;  %339 = vst [vmem:[%s769_s18 + $0x1a8] sm:$0xff] %v275_v43  ;;  %v280_v54 = vadd.f32 %v216_v51, %v216_v51  ;;  %v281_v55 = vadd.f32 %v217_v52, %v217_v52  ;;  %v218_v56 = vld [vmem:[%s754_s23 + $0x1e0] sm:$0xff]  ;;  %v219_v57 = vld [vmem:[%s754_s23 + $0x1e8] sm:$0xff] }
  0x4a   : > { %v220_v58 = vld [vmem:[%s754_s23 + $0x1f0] sm:$0xff]  ;;  %340 = vst [vmem:[%s769_s18 + $0x1b0] sm:$0xff] %v276_v47  ;;  %341 = vst [vmem:[%s769_s18 + $0x1b8] sm:$0xff] %v277_v48  ;;  %v282_v59 = vadd.f32 %v218_v56, %v218_v56  ;;  %v283_v60 = vadd.f32 %v219_v57, %v219_v57  ;;  %v221_v62 = vld [vmem:[%s754_s23 + $0x1f8] sm:$0xff] }
  0x4b   : > { %342 = vst [vmem:[%s769_s18 + $0x1c0] sm:$0xff] %v278_v49  ;;  %v284_v61 = vadd.f32 %v220_v58, %v220_v58  ;;  %343 = vst [vmem:[%s769_s18 + $0x1c8] sm:$0xff] %v279_v53  ;;  %v285_v63 = vadd.f32 %v221_v62, %v221_v62 }
  0x4c   : > { %344 = vst [vmem:[%s769_s18 + $0x1d0] sm:$0xff] %v280_v54  ;;  %345 = vst [vmem:[%s769_s18 + $0x1d8] sm:$0xff] %v281_v55 }
  0x4d   : > { %346 = vst [vmem:[%s769_s18 + $0x1e0] sm:$0xff] %v282_v59  ;;  %347 = vst [vmem:[%s769_s18 + $0x1e8] sm:$0xff] %v283_v60 }
  0x4e   : > { %348 = vst [vmem:[%s769_s18 + $0x1f0] sm:$0xff] %v284_v61  ;;  %349 = vst [vmem:[%s769_s18 + $0x1f8] sm:$0xff] %v285_v63 }
  0x4f   : > { %582 = shalt.err (!%p579_p6)
}
  0x50   : > { %s583_s4 = scalar_lea.hbm %s888_s27, 8192  ;;  %s587_s13 = scalar_lea.hbm %s945_s1, 32768 }
  0x51   : > { %p584_p7 = scmp.ne.s32.totalorder %s888_s27, %s583_s4  ;;  %p588_p12 = scmp.lt.s32.totalorder %s888_s27, %s945_s1 }
  0x52   : > { %p589_p1 = scmp.lt.s32.totalorder %s587_s13, %s583_s4 }
  0x53   : > { %p585_p10 = pnand %p584_p7, %p718_p9 }
  0x54   : > { %p590_p8 = por %p589_p1, %p588_p12 }
  0x55   : > { %p586_p4 = pneg %p585_p10 }
  0x57   : > { %p591_p13 = pnand %p590_p8, %p586_p4 }
  0x59   : > { %594 = shalt.err (!%p591_p13)
}
  0x5a   : > { %s655_s22 = smov 1024   ;;  %s656_s23 = smov 64  }
  0x5b   : > { %477 = dma.vmem_to_hbm [thread:$0]  (%p718_p9), %s890_s25, 8192, %s888_s27, %s351_s28, %s655_s22, %s655_s22, %s656_s23  }
  0x5c PF: > { %p488_p0 = scmp.ge.s32.totalorder %s649_s11, 2  ;;  %s382_s18 = sand.u32 1, %s629_s6  }
  0x5d   : > { %s383_s24 = scalar_lea.sflag [#allocation4], %s382_s18 }
  0x5e   : > { %p484_p2 = pnand %p488_p0, %p725_p11 }
  0x60   : > { %p485_p3 = pneg %p484_p2 }
  0x62   : > { %624 = dma.done.wait (%p485_p3), %s383_s24, 8192  }
  0x63   : > { %626 = vsyncadd (%p485_p3), %s383_s24, 4294959104  ;;  %s17_s11 = sadd.s32 1, %s649_s11   ;;  %s951_s6 = smov %s633_s7 }
  0x64   : > { %p14_p5 = scmp.ge.s32.totalorder %s17_s11, 6   ;;  %s952_s7 = smov %s637_s8 }
  0x65   : > { %s953_s8 = smov %s723_s20  ;;  %s954_s9 = smov %s645_s10 }
  0x66   : > { %s955_s10 = smov %s957_s14  ;;  %16 = sbr.rel (!%p14_p5) target bundleno = 6 (0x6), region = 69 }
  0x6b   :  { %388 = vsyncpa [#allocation3], 1 }
  0x6c   :  { %390 = vsyncpa [#allocation3 + $0x1], 1 }
  0x6d   :  { %391 = vsyncpa [#allocation4], 1 }
  0x6e   :  { %393 = vsyncpa [#allocation4 + $0x1], 1 }

</bundles_post_ra>
